<compile_context>
chip_gen: v7x
topology: tpu7x:2x2x1
jax: 0.10.0
libtpu: 0.0.40
codegen_flags: <defaults>
</compile_context>

<pallas_src>
import functools

import jax
import jax.numpy as jnp
from jax import lax
from jax.experimental import pallas as pl
from jax.experimental.pallas import tpu as pltpu


def _round_up(n, m):
    return ((n + m - 1) // m) * m


# ----------------------------- Pallas kernel ------------------------------- #
def _critic_kernel(x_ref, a_ref, w1x_ref, w1a_ref, b1_ref, w2_ref, b2_ref,
                   w3_ref, b3_ref, wq_ref, bq_ref, o_ref):
    mdt = w2_ref.dtype          # matmul operand dtype (bf16 default, f32 option)
    f32 = jnp.float32

    def mm(lhs, w_ref):
        return jnp.dot(lhs.astype(mdt), w_ref[...], preferred_element_type=f32)

    # fc1: torch.cat([x, a / max_action]) @ w1  ==  x @ w1x + a @ w1a
    # (1/max_action is folded into w1a once, in prepare_critic_params).
    h = jnp.maximum(
        mm(x_ref[...], w1x_ref) + mm(a_ref[...], w1a_ref) + b1_ref[...], 0.0)
    h = jnp.maximum(mm(h, w2_ref) + b2_ref[...], 0.0)
    h = jnp.maximum(mm(h, w3_ref) + b3_ref[...], 0.0)

    # q_out, lane-dense: (1, H) x (TB, H)^T -> (1, TB) row (NT dot_general).
    q_row = lax.dot_general(
        wq_ref[...], h.astype(mdt),
        dimension_numbers=(((1,), (1,)), ((), ())),
        preferred_element_type=f32)                       # (1, TB)
    o_ref[...] = q_row + bq_ref[...]                      # bq broadcasts (1,1)


# ----------------------- one-time parameter preparation --------------------- #
def prepare_critic_params(params, action_dim, max_action=1.0,
                          matmul_dtype=jnp.bfloat16):
    """Split / scale / cast the weights ONCE (outside the training-step hot loop).

    params: dict with w1 (D,H), b1 (H,), w2/b2, w3/b3, wq (H,1), bq (1,)
            where D = obs_dim + goal_dim + action_dim, weights stored (in, out).
    max_action is folded into the action rows of w1 here (exactly the
    `actions / max_action` of the reference module).
    """
    f32 = jnp.float32
    w1 = jnp.asarray(params["w1"], f32)
    D, H = w1.shape
    dx = D - action_dim

    w1x = w1[:dx]                                    # observation+goal rows
    w1a = w1[dx:] * jnp.asarray(1.0 / max_action, f32)   # action rows, scaled

    wq = jnp.asarray(params["wq"], f32).reshape(H, 1)
    wq_t = wq.T                                      # (1, H), lane-dense

    return {
        "w1x": w1x.astype(matmul_dtype),
        "w1a": w1a.astype(matmul_dtype),
        "b1": jnp.asarray(params["b1"], f32).reshape(1, H),
        "w2": jnp.asarray(params["w2"], f32).astype(matmul_dtype),
        "b2": jnp.asarray(params["b2"], f32).reshape(1, H),
        "w3": jnp.asarray(params["w3"], f32).astype(matmul_dtype),
        "b3": jnp.asarray(params["b3"], f32).reshape(1, H),
        "wq": wq_t.astype(matmul_dtype),
        "bq": jnp.asarray(params["bq"], f32).reshape(1, 1),
    }


# --------------------------------- forward ---------------------------------- #
@functools.partial(jax.jit, static_argnames=("block_rows",))
def critic_forward(x, actions, prepared_params, block_rows=1024):
    """Pallas implementation of Critic.forward.

    x:               (B, obs_dim + goal_dim) float32
    actions:         (B, action_dim) float32
    prepared_params: output of prepare_critic_params (prepared once;
                     max_action already folded in)
    returns:         (B, 1) float32 q-values
    """
    x = jnp.asarray(x, jnp.float32)
    actions = jnp.asarray(actions, jnp.float32)
    B, dx = x.shape
    da = actions.shape[1]

    pp = prepared_params
    H = pp["w2"].shape[0]
    wbytes = (pp["w1x"].size + pp["w1a"].size + pp["w2"].size + pp["w3"].size
              + pp["wq"].size) * pp["w2"].dtype.itemsize + (3 * H + 1) * 4

    # Batch tiling:
    #  * tiny batches (<=256 rows): single 8-aligned tile (grid = 1).
    #  * larger batches: TB is a multiple of 256 (MXU-native, lane-dense output
    #    blocks), capped at block_rows AND capped so the grid has >= 2 steps so
    #    the "parallel" axis shards across both v7x TensorCores.
    B8 = _round_up(B, 8)
    if B8 <= 256:
        TB = B8
    else:
        TB = min(_round_up(int(block_rows), 256),
                 _round_up(pl.cdiv(B, 2), 256))
        TB = max(TB, 256)
    Bp = _round_up(B, TB)
    grid = (Bp // TB,)

    if Bp != B:  # cheap batch-only pad (features stay unpadded in HBM)
        x = jnp.pad(x, ((0, Bp - B), (0, 0)))
        actions = jnp.pad(actions, ((0, Bp - B), (0, 0)))

    flops = 2 * Bp * ((dx + da) * H + 2 * H * H + H)
    bytes_accessed = Bp * (dx + da) * 4 + Bp * 4 + wbytes

    row = lambda i: (i, 0)      # batch-tiled inputs
    out_row = lambda i: (0, i)  # lane-dense output row
    const = lambda i: (0, 0)    # weights/biases: resident in VMEM (DMA'd once)

    q = pl.pallas_call(
        _critic_kernel,
        out_shape=jax.ShapeDtypeStruct((1, Bp), jnp.float32),
        grid=grid,
        in_specs=[
            pl.BlockSpec((TB, dx), row),       # x tile
            pl.BlockSpec((TB, da), row),       # actions tile
            pl.BlockSpec((dx, H), const),      # w1x (obs+goal rows)
            pl.BlockSpec((da, H), const),      # w1a (action rows, pre-scaled)
            pl.BlockSpec((1, H), const),       # b1
            pl.BlockSpec((H, H), const),       # w2
            pl.BlockSpec((1, H), const),       # b2
            pl.BlockSpec((H, H), const),       # w3
            pl.BlockSpec((1, H), const),       # b3
            pl.BlockSpec((1, H), const),       # wq (row form)
            pl.BlockSpec((1, 1), const),       # bq
        ],
        out_specs=pl.BlockSpec((1, TB), out_row),
        compiler_params=pltpu.CompilerParams(
            dimension_semantics=("parallel",),         # megacore on v7x
            vmem_limit_bytes=32 * 1024 * 1024),
        cost_estimate=pl.CostEstimate(
            flops=int(flops), transcendentals=0,
            bytes_accessed=int(bytes_accessed)),
    )(x, actions,
      pp["w1x"], pp["w1a"], pp["b1"],
      pp["w2"], pp["b2"], pp["w3"], pp["b3"],
      pp["wq"], pp["bq"])

    return q.reshape(Bp, 1)[:B]


# --------------------------- parameter creation ----------------------------- #
def init_critic_params(key, obs_dim, goal_dim, action_dim, hidden=256):
    """Deterministic init mimicking nn.Linear default (uniform +/- 1/sqrt(fan_in)).
    Weights stored as (in_features, out_features)."""
    in_dim = obs_dim + goal_dim + action_dim
    dims = [(in_dim, hidden), (hidden, hidden), (hidden, hidden), (hidden, 1)]
    names = ["1", "2", "3", "q"]
    params = {}
    for (fin, fout), n in zip(dims, names):
        key, kw, kb = jax.random.split(key, 3)
        bound = 1.0 / jnp.sqrt(jnp.float32(fin))
        params[f"w{n}"] = jax.random.uniform(
            kw, (fin, fout), jnp.float32, -bound, bound)
        params[f"b{n}"] = jax.random.uniform(
            kb, (fout,), jnp.float32, -bound, bound)
    return params


# ------------------------------ reference ----------------------------------- #
def critic_ref(x, actions, params, max_action=1.0):
    h = jnp.concatenate([x, actions / max_action], axis=1)
    h = jax.nn.relu(h @ params["w1"] + params["b1"])
    h = jax.nn.relu(h @ params["w2"] + params["b2"])
    h = jax.nn.relu(h @ params["w3"] + params["b3"])
    return h @ params["wq"] + params["bq"]


if __name__ == "__main__":
    # Small shapes consistent with the module: obs_dim=10, goal_dim=5, action_dim=4
    obs_dim, goal_dim, action_dim = 10, 5, 4
    batch = 2
    max_action = 2.0

    key = jax.random.PRNGKey(0)
    kp, kx, ka = jax.random.split(key, 3)
    params = init_critic_params(kp, obs_dim, goal_dim, action_dim)

    x = jax.random.normal(kx, (batch, obs_dim + goal_dim), jnp.float32)
    actions = jax.random.normal(ka, (batch, action_dim), jnp.float32)

    # Weight split / scaling / casts happen ONCE, outside the hot path.
    pp_f32 = prepare_critic_params(params, action_dim, max_action=max_action,
                                   matmul_dtype=jnp.float32)
    pp_bf16 = prepare_critic_params(params, action_dim, max_action=max_action)

    q_ref = critic_ref(x, actions, params, max_action=max_action)

    # Small batch, single tile, f32 (tight tolerance).
    q = jax.block_until_ready(critic_forward(x, actions, pp_f32))
    assert q.shape == (batch, 1), q.shape
    assert jnp.allclose(q, q_ref, atol=1e-4, rtol=1e-4), (q, q_ref)

    # Small batch, bf16 default path (relaxed tolerance).
    qb = jax.block_until_ready(critic_forward(x, actions, pp_bf16))
    assert qb.shape == (batch, 1), qb.shape
    assert jnp.allclose(qb, q_ref, atol=5e-2, rtol=5e-2), (qb, q_ref)

    # Larger batch: exercises the multi-step grid (TB=256, grid=2), batch
    # padding, resident weights, lane-dense output blocks.
    kx2, ka2 = jax.random.split(jax.random.PRNGKey(1))
    B2 = 300
    x2 = jax.random.normal(kx2, (B2, obs_dim + goal_dim), jnp.float32)
    a2 = jax.random.normal(ka2, (B2, action_dim), jnp.float32)
    q2_ref = critic_ref(x2, a2, params, max_action=max_action)

    q2 = jax.block_until_ready(critic_forward(x2, a2, pp_f32))
    assert q2.shape == (B2, 1), q2.shape
    assert jnp.allclose(q2, q2_ref, atol=1e-4, rtol=1e-4)

    q3 = jax.block_until_ready(critic_forward(x2, a2, pp_bf16))
    assert q3.shape == (B2, 1), q3.shape
    assert jnp.allclose(q3, q2_ref, atol=5e-2, rtol=5e-2)

    print("KERNEL_OK")
</pallas_src>

<mosaic_0001>
module attributes {stable_mosaic.version = 11 : i64} {
  func.func @_critic_kernel(%arg0: i32, %arg1: memref<8x15xf32, #tpu.memory_space<vmem>>, %arg2: memref<8x4xf32, #tpu.memory_space<vmem>>, %arg3: memref<15x256xf32, #tpu.memory_space<vmem>>, %arg4: memref<4x256xf32, #tpu.memory_space<vmem>>, %arg5: memref<1x256xf32, #tpu.memory_space<vmem>>, %arg6: memref<256x256xf32, #tpu.memory_space<vmem>>, %arg7: memref<1x256xf32, #tpu.memory_space<vmem>>, %arg8: memref<256x256xf32, #tpu.memory_space<vmem>>, %arg9: memref<1x256xf32, #tpu.memory_space<vmem>>, %arg10: memref<1x256xf32, #tpu.memory_space<vmem>>, %arg11: memref<1x1xf32, #tpu.memory_space<vmem>>, %arg12: memref<1x8xf32, #tpu.memory_space<vmem>>) attributes {dimension_semantics = [#tpu.dimension_semantics<parallel>], iteration_bounds = array<i64: 1>, scalar_prefetch = 0 : i64, scratch_operands = 0 : i64, tpu.core_type = #tpu.core_type<tc>, window_params = [{transform_indices = @transform_0, window_bounds = array<i64: 8, 15>}, {transform_indices = @transform_1, window_bounds = array<i64: 8, 4>}, {pipeline_mode = #tpu.pipeline_mode<synchronous>, transform_indices = @transform_2, window_bounds = array<i64: 15, 256>}, {pipeline_mode = #tpu.pipeline_mode<synchronous>, transform_indices = @transform_3, window_bounds = array<i64: 4, 256>}, {pipeline_mode = #tpu.pipeline_mode<synchronous>, transform_indices = @transform_4, window_bounds = array<i64: 1, 256>}, {pipeline_mode = #tpu.pipeline_mode<synchronous>, transform_indices = @transform_5, window_bounds = array<i64: 256, 256>}, {pipeline_mode = #tpu.pipeline_mode<synchronous>, transform_indices = @transform_6, window_bounds = array<i64: 1, 256>}, {pipeline_mode = #tpu.pipeline_mode<synchronous>, transform_indices = @transform_7, window_bounds = array<i64: 256, 256>}, {pipeline_mode = #tpu.pipeline_mode<synchronous>, transform_indices = @transform_8, window_bounds = array<i64: 1, 256>}, {pipeline_mode = #tpu.pipeline_mode<synchronous>, transform_indices = @transform_9, window_bounds = array<i64: 1, 256>}, {pipeline_mode = #tpu.pipeline_mode<synchronous>, transform_indices = @transform_10, window_bounds = array<i64: 1, 1>}, {transform_indices = @transform_11, window_bounds = array<i64: 1, 8>}]} {
    %c0 = arith.constant 0 : index
    %c0_0 = arith.constant 0 : index
    %0 = vector.load %arg1[%c0, %c0_0] : memref<8x15xf32, #tpu.memory_space<vmem>>, vector<8x15xf32>
    %c0_1 = arith.constant 0 : index
    %c0_2 = arith.constant 0 : index
    %1 = vector.load %arg3[%c0_1, %c0_2] : memref<15x256xf32, #tpu.memory_space<vmem>>, vector<15x256xf32>
    %cst = arith.constant dense<0.000000e+00> : vector<8x256xf32>
    %2 = tpu.matmul %0, %1, %cst {dimension_numbers = #tpu.dot_dimension_numbers<[1], [0], [0], [1], [0, 0, 1, 1], [], []>} : vector<8x15xf32>, vector<15x256xf32>, vector<8x256xf32> -> vector<8x256xf32>
    %c0_3 = arith.constant 0 : index
    %c0_4 = arith.constant 0 : index
    %3 = vector.load %arg2[%c0_3, %c0_4] : memref<8x4xf32, #tpu.memory_space<vmem>>, vector<8x4xf32>
    %c0_5 = arith.constant 0 : index
    %c0_6 = arith.constant 0 : index
    %4 = vector.load %arg4[%c0_5, %c0_6] : memref<4x256xf32, #tpu.memory_space<vmem>>, vector<4x256xf32>
    %cst_7 = arith.constant dense<0.000000e+00> : vector<8x256xf32>
    %5 = tpu.matmul %3, %4, %cst_7 {dimension_numbers = #tpu.dot_dimension_numbers<[1], [0], [0], [1], [0, 0, 1, 1], [], []>} : vector<8x4xf32>, vector<4x256xf32>, vector<8x256xf32> -> vector<8x256xf32>
    %6 = arith.addf %2, %5 : vector<8x256xf32>
    %c0_8 = arith.constant 0 : index
    %c0_9 = arith.constant 0 : index
    %7 = vector.load %arg5[%c0_8, %c0_9] : memref<1x256xf32, #tpu.memory_space<vmem>>, vector<1x256xf32>
    %8 = vector.broadcast %7 : vector<1x256xf32> to vector<8x256xf32>
    %9 = arith.addf %6, %8 : vector<8x256xf32>
    %cst_10 = arith.constant 0.000000e+00 : f32
    %10 = vector.broadcast %cst_10 : f32 to vector<8x256xf32>
    %11 = arith.maximumf %9, %10 : vector<8x256xf32>
    %c0_11 = arith.constant 0 : index
    %c0_12 = arith.constant 0 : index
    %12 = vector.load %arg6[%c0_11, %c0_12] : memref<256x256xf32, #tpu.memory_space<vmem>>, vector<256x256xf32>
    %cst_13 = arith.constant dense<0.000000e+00> : vector<8x256xf32>
    %13 = tpu.matmul %11, %12, %cst_13 {dimension_numbers = #tpu.dot_dimension_numbers<[1], [0], [0], [1], [0, 0, 1, 1], [], []>} : vector<8x256xf32>, vector<256x256xf32>, vector<8x256xf32> -> vector<8x256xf32>
    %c0_14 = arith.constant 0 : index
    %c0_15 = arith.constant 0 : index
    %14 = vector.load %arg7[%c0_14, %c0_15] : memref<1x256xf32, #tpu.memory_space<vmem>>, vector<1x256xf32>
    %15 = vector.broadcast %14 : vector<1x256xf32> to vector<8x256xf32>
    %16 = arith.addf %13, %15 : vector<8x256xf32>
    %cst_16 = arith.constant 0.000000e+00 : f32
    %17 = vector.broadcast %cst_16 : f32 to vector<8x256xf32>
    %18 = arith.maximumf %16, %17 : vector<8x256xf32>
    %c0_17 = arith.constant 0 : index
    %c0_18 = arith.constant 0 : index
    %19 = vector.load %arg8[%c0_17, %c0_18] : memref<256x256xf32, #tpu.memory_space<vmem>>, vector<256x256xf32>
    %cst_19 = arith.constant dense<0.000000e+00> : vector<8x256xf32>
    %20 = tpu.matmul %18, %19, %cst_19 {dimension_numbers = #tpu.dot_dimension_numbers<[1], [0], [0], [1], [0, 0, 1, 1], [], []>} : vector<8x256xf32>, vector<256x256xf32>, vector<8x256xf32> -> vector<8x256xf32>
    %c0_20 = arith.constant 0 : index
    %c0_21 = arith.constant 0 : index
    %21 = vector.load %arg9[%c0_20, %c0_21] : memref<1x256xf32, #tpu.memory_space<vmem>>, vector<1x256xf32>
    %22 = vector.broadcast %21 : vector<1x256xf32> to vector<8x256xf32>
    %23 = arith.addf %20, %22 : vector<8x256xf32>
    %cst_22 = arith.constant 0.000000e+00 : f32
    %24 = vector.broadcast %cst_22 : f32 to vector<8x256xf32>
    %25 = arith.maximumf %23, %24 : vector<8x256xf32>
    %c0_23 = arith.constant 0 : index
    %c0_24 = arith.constant 0 : index
    %26 = vector.load %arg10[%c0_23, %c0_24] : memref<1x256xf32, #tpu.memory_space<vmem>>, vector<1x256xf32>
    %cst_25 = arith.constant dense<0.000000e+00> : vector<1x8xf32>
    %27 = tpu.matmul %26, %25, %cst_25 {dimension_numbers = #tpu.dot_dimension_numbers<[1], [1], [0], [0], [0, 0, 1, 0], [], []>} : vector<1x256xf32>, vector<8x256xf32>, vector<1x8xf32> -> vector<1x8xf32>
    %c0_26 = arith.constant 0 : index
    %c0_27 = arith.constant 0 : index
    %28 = vector.load %arg11[%c0_26, %c0_27] : memref<1x1xf32, #tpu.memory_space<vmem>>, vector<1x1xf32>
    %29 = vector.broadcast %28 : vector<1x1xf32> to vector<1x8xf32>
    %30 = arith.addf %27, %29 : vector<1x8xf32>
    %c0_28 = arith.constant 0 : index
    %c0_29 = arith.constant 0 : index
    %31 = vector.load %arg12[%c0_28, %c0_29] : memref<1x8xf32, #tpu.memory_space<vmem>>, vector<1x8xf32>
    tpu.vector_store %arg12[%c0_28, %c0_29], %30 {strides = array<i32>} : memref<1x8xf32, #tpu.memory_space<vmem>>, vector<1x8xf32>,
    return
  }
  func.func @transform_0(%arg0: i32) -> (i32, i32) {
    %c0_i32 = arith.constant 0 : i32
    %c0_i32_0 = arith.constant 0 : i32
    return %arg0, %c0_i32 : i32, i32
  }
  func.func @transform_1(%arg0: i32) -> (i32, i32) {
    %c0_i32 = arith.constant 0 : i32
    %c0_i32_0 = arith.constant 0 : i32
    return %arg0, %c0_i32 : i32, i32
  }
  func.func @transform_2(%arg0: i32) -> (i32, i32) {
    %c0_i32 = arith.constant 0 : i32
    %c0_i32_0 = arith.constant 0 : i32
    %c0_i32_1 = arith.constant 0 : i32
    return %c0_i32, %c0_i32_0 : i32, i32
  }
  func.func @transform_3(%arg0: i32) -> (i32, i32) {
    %c0_i32 = arith.constant 0 : i32
    %c0_i32_0 = arith.constant 0 : i32
    %c0_i32_1 = arith.constant 0 : i32
    return %c0_i32, %c0_i32_0 : i32, i32
  }
  func.func @transform_4(%arg0: i32) -> (i32, i32) {
    %c0_i32 = arith.constant 0 : i32
    %c0_i32_0 = arith.constant 0 : i32
    %c0_i32_1 = arith.constant 0 : i32
    return %c0_i32, %c0_i32_0 : i32, i32
  }
  func.func @transform_5(%arg0: i32) -> (i32, i32) {
    %c0_i32 = arith.constant 0 : i32
    %c0_i32_0 = arith.constant 0 : i32
    %c0_i32_1 = arith.constant 0 : i32
    return %c0_i32, %c0_i32_0 : i32, i32
  }
  func.func @transform_6(%arg0: i32) -> (i32, i32) {
    %c0_i32 = arith.constant 0 : i32
    %c0_i32_0 = arith.constant 0 : i32
    %c0_i32_1 = arith.constant 0 : i32
    return %c0_i32, %c0_i32_0 : i32, i32
  }
  func.func @transform_7(%arg0: i32) -> (i32, i32) {
    %c0_i32 = arith.constant 0 : i32
    %c0_i32_0 = arith.constant 0 : i32
    %c0_i32_1 = arith.constant 0 : i32
    return %c0_i32, %c0_i32_0 : i32, i32
  }
  func.func @transform_8(%arg0: i32) -> (i32, i32) {
    %c0_i32 = arith.constant 0 : i32
    %c0_i32_0 = arith.constant 0 : i32
    %c0_i32_1 = arith.constant 0 : i32
    return %c0_i32, %c0_i32_0 : i32, i32
  }
  func.func @transform_9(%arg0: i32) -> (i32, i32) {
    %c0_i32 = arith.constant 0 : i32
    %c0_i32_0 = arith.constant 0 : i32
    %c0_i32_1 = arith.constant 0 : i32
    return %c0_i32, %c0_i32_0 : i32, i32
  }
  func.func @transform_10(%arg0: i32) -> (i32, i32) {
    %c0_i32 = arith.constant 0 : i32
    %c0_i32_0 = arith.constant 0 : i32
    %c0_i32_1 = arith.constant 0 : i32
    return %c0_i32, %c0_i32_0 : i32, i32
  }
  func.func @transform_11(%arg0: i32) -> (i32, i32) {
    %c0_i32 = arith.constant 0 : i32
    %c0_i32_0 = arith.constant 0 : i32
    return %c0_i32, %arg0 : i32, i32
  }
}

</mosaic_0001>

<bundles_post_ra>
// kernel: critic_forward.1
= control target key start
LH: loop header
LB: loop body
LE: loop exit
PB: predicated region body
PF: predicated region fallthrough
CT: control target
= control target key end

     0   :  { %s992_s0 = inlined_call_operand.vmem [shape: f32[8,15], index: 0, kind: input, shape index: {}]   ;;  %s993_s1 = inlined_call_operand.vmem [shape: f32[8,4], index: 1, kind: input, shape index: {}]   ;;  %s994_s2 = inlined_call_operand.vmem [shape: f32[15,256], index: 2, kind: input, shape index: {}]   ;;  %s995_s3 = inlined_call_operand.vmem [shape: f32[4,256], index: 3, kind: input, shape index: {}]   ;;  %s996_s4 = inlined_call_operand.vmem [shape: f32[1,256], index: 4, kind: input, shape index: {}]   ;;  %s997_s5 = inlined_call_operand.hbm [shape: f32[256,256], index: 5, kind: input, shape index: {}]   ;;  %s998_s6 = inlined_call_operand.vmem [shape: f32[1,256], index: 6, kind: input, shape index: {}]   ;;  %s999_s7 = inlined_call_operand.hbm [shape: f32[256,256], index: 7, kind: input, shape index: {}]   ;;  %s1000_s8 = inlined_call_operand.vmem [shape: f32[1,256], index: 8, kind: input, shape index: {}]   ;;  %s1001_s9 = inlined_call_operand.vmem [shape: f32[1,256], index: 9, kind: input, shape index: {}]   ;;  %s1002_s10 = inlined_call_operand.<no memory space> [shape: f32[1,1], index: 10, kind: input, shape index: {}]   ;;  %s1003_s11 = inlined_call_operand.vmem [shape: f32[1,8], index: 11, kind: output, shape index: {}]  }
   0x1   :  { %v16_v0 = vstv %s1002_s10 }
   0x2   :  { %17 = vst [vmem:[#allocation2] sm:$0x1] %v16_v0 }
   0x3   :  { %18 = vsyncpa [#allocation4], 0 }
   0x4   :  { %19 = vsyncpa [#allocation6], 0  ;;  %s852_s19 = smov [#allocation3]   ;;  %s804_s23 = scalar_lea.hbm %s997_s5, 8192 }
   0x5   :  { %s35_s20 = sshll.u32 %s852_s19, 4  ;;  %p805_p0 = scmp.ne.s32.totalorder %s997_s5, %s804_s23  ;;  %s36_s20 = int_to_ptr.vmem [resolvable:$true] %s35_s20 }
   0x6   :  { %p808_p1 = scmp.lt.u32.totalorder %s804_s23, %s997_s5 }
   0x8   :  { %p810_p2 = pnand %p808_p1, %p805_p0 }
   0xa   :  { %813 = shalt.err (!%p810_p2)
}
   0xb   :  { %s814_s10 = scalar_lea.vmem %s36_s20, 8192  ;;  %p819_p4 = scmp.lt.s32.totalorder %s36_s20, %s36_s20 }
   0xc   :  { %p815_p3 = scmp.ne.s32.totalorder %s36_s20, %s814_s10  ;;  %p820_p5 = scmp.lt.s32.totalorder %s814_s10, %s814_s10 }
   0xe   :  { %p821_p6 = por %p820_p5, %p819_p4 }
  0x10   :  { %p822_p7 = pnand %p821_p6, %p815_p3 }
  0x12   :  { %825 = shalt.err (!%p822_p7)
}
  0x13   :  { %s853_s28 = smov 256   ;;  %s854_s29 = smov 16  }
  0x14   :  { %41 = dma.hbm_to_vmem [thread:$0]  %s997_s5, 8192, %s36_s20, [#allocation4], %s853_s28, %s853_s28, %s854_s29  }
  0x15   :  { %s855_s13 = smov [#allocation5]   ;;  %s826_s17 = scalar_lea.hbm %s999_s7, 8192 }
  0x16   :  { %s49_s14 = sshll.u32 %s855_s13, 4  ;;  %p827_p8 = scmp.ne.s32.totalorder %s999_s7, %s826_s17  ;;  %s50_s14 = int_to_ptr.vmem [resolvable:$true] %s49_s14 }
  0x17   :  { %p830_p9 = scmp.lt.u32.totalorder %s826_s17, %s999_s7 }
  0x19   :  { %p832_p10 = pnand %p830_p9, %p827_p8 }
  0x1b   :  { %835 = shalt.err (!%p832_p10)
}
  0x1c   :  { %s836_s23 = scalar_lea.vmem %s50_s14, 8192  ;;  %p841_p12 = scmp.lt.s32.totalorder %s50_s14, %s50_s14 }
  0x1d   :  { %p837_p11 = scmp.ne.s32.totalorder %s50_s14, %s836_s23  ;;  %p842_p13 = scmp.lt.s32.totalorder %s836_s23, %s836_s23 }
  0x1f   :  { %p843_p0 = por %p842_p13, %p841_p12 }
  0x21   :  { %p844_p1 = pnand %p843_p0, %p837_p11 }
  0x23   :  { %847 = shalt.err (!%p844_p1)
}
  0x24   :  { %55 = dma.hbm_to_vmem [thread:$0]  %s999_s7, 8192, %s50_s14, [#allocation6], %s853_s28, %s853_s28, %s854_s29  }
  0x25   :  { %848 = dma.done.wait [#allocation4], 8192  }
  0x26   :  { %849 = vsyncadd [#allocation4], 4294959104 }
  0x27   :  { %850 = dma.done.wait [#allocation6], 8192  }
  0x28   :  { %851 = vsyncadd [#allocation6], 4294959104  ;;  %v856_v1 = vmov 0.0   ;;  %vm161_vm0 = vcmask 1046528   ;;  %v74_v2 = vld [vmem:[%s995_s3] sm:$0xff]  ;;  %vm81_vm1 = vcmask 1043456  }
  0x29   :  { %150 = vmatprep.mubr.f32.mxu0 %v856_v1  ;;  %v70_v3 = vld [vmem:[%s994_s2 + $0x8] sm:$0xff]  ;;  %vm857_vm2 = vmmov 1   ;;  %v76_v5 = vcombine.high %v74_v2, %v74_v2  ;;  %v72_v6 = vld [vmem:[%s994_s2 + $0x18] sm:$0x7f]  ;;  %v69_v7 = vld [vmem:[%s994_s2] sm:$0xff]  ;;  %vm77_vm4 = vcmask 31744  }
  0x2a   :  { %vm952_vm3 = vmpackc.low %vm161_vm0, %vm857_vm2  ;;  %v71_v8 = vld [vmem:[%s994_s2 + $0x10] sm:$0x7f]  ;;  %v73_v9 = vld [vmem:[%s993_s1] sm:$0xff]  ;;  %v659_v10 = vpack.c.bf16 %v72_v6, %v70_v3  ;;  %vm157_vm5 = vcmask 121856   ;;  %vm645_vm6 = vcmask 57344  }
  0x2b   :  { %v662_v11 = vpack.c.bf16 %v71_v8, %v69_v7  ;;  %v256_v12 = vld [vmem:[#allocation3 + $0x8] sm:$0xff]  ;;  %v258_v13 = vld [vmem:[#allocation3 + $0x18] sm:$0xff]  ;;  %653 = vmatprep.subr.msk.mxu0 %vm81_vm1, %v76_v5  ;;  %v255_v15 = vld [vmem:[#allocation3] sm:$0xff] }
  0x2c   :  { %v665_v14 = vpack.c.bf16 %v258_v13, %v256_v12  ;;  %v257_v16 = vld [vmem:[#allocation3 + $0x10] sm:$0xff]  ;;  %v260_v17 = vld [vmem:[#allocation3 + $0x28] sm:$0xff]  ;;  %654 = vmatpush1.msk.msra.mxu0 %vm81_vm1, %v74_v2  ;;  %v262_v19 = vld [vmem:[#allocation3 + $0x38] sm:$0xff] }
  0x2d   :  { %v667_v18 = vpack.c.bf16 %v257_v16, %v255_v15  ;;  %655 = vmatmul.mubr.msk.f32.vlgmr.msra.gmra.mrb[0].mxu0 %vm77_vm4, %v73_v9  ;;  %661 = vmatprep.subr.msk.bf16.mxu0 %vm952_vm3, %v659_v10  ;;  %v669_v20 = vpack.c.bf16 %v262_v19, %v260_v17  ;;  %v259_v21 = vld [vmem:[#allocation3 + $0x20] sm:$0xff]  ;;  %v261_v22 = vld [vmem:[#allocation3 + $0x30] sm:$0xff]  ;;  %v264_v23 = vld [vmem:[#allocation3 + $0x48] sm:$0xff] }
  0x2e   :  { %664 = vmatpush1.bf16.msk.msra.mxu0 %vm952_vm3, %v662_v11  ;;  %232 = vmatprep.mubr.f32.mxu0 %v856_v1  ;;  %v266_v24 = vld [vmem:[#allocation3 + $0x58] sm:$0xff]  ;;  %v671_v25 = vpack.c.bf16 %v261_v22, %v259_v21  ;;  %v263_v27 = vld [vmem:[#allocation3 + $0x40] sm:$0xff]  ;;  %v265_v28 = vld [vmem:[#allocation3 + $0x50] sm:$0xff] }
  0x2f   :  { %666 = vmatprep.subr.bf16.mxu1 %v665_v14  ;;  %v673_v26 = vpack.c.bf16 %v266_v24, %v264_v23  ;;  %v68_v29 = vld [vmem:[%s992_s0] sm:$0xff]  ;;  %v268_v30 = vld [vmem:[#allocation3 + $0x68] sm:$0xff]  ;;  %v675_v32 = vpack.c.bf16 %v265_v28, %v263_v27  ;;  %v269_v35 = vld [vmem:[#allocation3 + $0x70] sm:$0xff] }
  0x30   :  { %668 = vmatpush1.bf16.msra.mxu1 %v667_v18  ;;  %v270_v31 = vld [vmem:[#allocation3 + $0x78] sm:$0xff]  ;;  %v267_v34 = vld [vmem:[#allocation3 + $0x60] sm:$0xff]  ;;  %v272_v36 = vld [vmem:[#allocation3 + $0x88] sm:$0xff] }
  0x31   :  { %670 = vmatprep.subr.bf16.mxu1 %v669_v20  ;;  %v677_v33 = vpack.c.bf16 %v270_v31, %v268_v30  ;;  %v274_v37 = vld [vmem:[#allocation3 + $0x98] sm:$0xff]  ;;  %v679_v38 = vpack.c.bf16 %v269_v35, %v267_v34  ;;  %v271_v40 = vld [vmem:[#allocation3 + $0x80] sm:$0xff]  ;;  %v273_v41 = vld [vmem:[#allocation3 + $0x90] sm:$0xff] }
  0x32   :  { %v681_v39 = vpack.c.bf16 %v274_v37, %v272_v36  ;;  %v276_v42 = vld [vmem:[#allocation3 + $0xa8] sm:$0xff]  ;;  %v278_v43 = vld [vmem:[#allocation3 + $0xb8] sm:$0xff]  ;;  %v683_v44 = vpack.c.bf16 %v273_v41, %v271_v40  ;;  %v275_v46 = vld [vmem:[#allocation3 + $0xa0] sm:$0xff] }
  0x33   :  { %v685_v45 = vpack.c.bf16 %v278_v43, %v276_v42  ;;  %v277_v47 = vld [vmem:[#allocation3 + $0xb0] sm:$0xff]  ;;  %v280_v48 = vld [vmem:[#allocation3 + $0xc8] sm:$0xff]  ;;  %v282_v49 = vld [vmem:[#allocation3 + $0xd8] sm:$0xff] }
  0x34   :  { %672 = vmatpush1.bf16.msra.mxu1 %v671_v25  ;;  %v687_v50 = vpack.c.bf16 %v277_v47, %v275_v46  ;;  %v689_v51 = vpack.c.bf16 %v282_v49, %v280_v48  ;;  %v279_v52 = vld [vmem:[#allocation3 + $0xc0] sm:$0xff]  ;;  %v281_v53 = vld [vmem:[#allocation3 + $0xd0] sm:$0xff]  ;;  %v284_v54 = vld [vmem:[#allocation3 + $0xe8] sm:$0xff] }
  0x35   :  { %658 = vmatmul.mubr.msk.f32.vlgmr.msra.gmra.mrb[0].mxu0 %vm157_vm5, %v68_v29  ;;  %674 = vmatprep.subr.bf16.mxu1 %v673_v26  ;;  %v286_v55 = vld [vmem:[#allocation3 + $0xf8] sm:$0xff]  ;;  %v691_v56 = vpack.c.bf16 %v281_v53, %v279_v52  ;;  %v283_v58 = vld [vmem:[#allocation3 + $0xe0] sm:$0xff]  ;;  %v285_v59 = vld [vmem:[#allocation3 + $0xf0] sm:$0xff] }
  0x36   :  { %v693_v57 = vpack.c.bf16 %v286_v55, %v284_v54  ;;  %v288_v60 = vld [vmem:[#allocation3 + $0x108] sm:$0xff]  ;;  %v290_v61 = vld [vmem:[#allocation3 + $0x118] sm:$0xff]  ;;  %v695_v62 = vpack.c.bf16 %v285_v59, %v283_v58  ;;  %v287_v0 = vld [vmem:[#allocation3 + $0x100] sm:$0xff] }
  0x37   :  { %v697_v63 = vpack.c.bf16 %v290_v61, %v288_v60  ;;  %v289_v1 = vld [vmem:[#allocation3 + $0x110] sm:$0xff]  ;;  %v292_v2 = vld [vmem:[#allocation3 + $0x128] sm:$0xff]  ;;  %v294_v3 = vld [vmem:[#allocation3 + $0x138] sm:$0xff] }
  0x38   :  { %676 = vmatpush1.bf16.msra.mxu1 %v675_v32  ;;  %v699_v4 = vpack.c.bf16 %v289_v1, %v287_v0  ;;  %v701_v5 = vpack.c.bf16 %v294_v3, %v292_v2  ;;  %v291_v6 = vld [vmem:[#allocation3 + $0x120] sm:$0xff]  ;;  %v293_v7 = vld [vmem:[#allocation3 + $0x130] sm:$0xff]  ;;  %v296_v8 = vld [vmem:[#allocation3 + $0x148] sm:$0xff] }
  0x39   :  { %678 = vmatprep.subr.bf16.mxu1 %v677_v33  ;;  %v298_v9 = vld [vmem:[#allocation3 + $0x158] sm:$0xff]  ;;  %v703_v10 = vpack.c.bf16 %v293_v7, %v291_v6  ;;  %v295_v12 = vld [vmem:[#allocation3 + $0x140] sm:$0xff]  ;;  %v297_v13 = vld [vmem:[#allocation3 + $0x150] sm:$0xff] }
  0x3a   :  { %v705_v11 = vpack.c.bf16 %v298_v9, %v296_v8  ;;  %v300_v14 = vld [vmem:[#allocation3 + $0x168] sm:$0xff]  ;;  %v302_v15 = vld [vmem:[#allocation3 + $0x178] sm:$0xff]  ;;  %v707_v16 = vpack.c.bf16 %v297_v13, %v295_v12  ;;  %v299_v18 = vld [vmem:[#allocation3 + $0x160] sm:$0xff] }
  0x3b   :  { %v709_v17 = vpack.c.bf16 %v302_v15, %v300_v14  ;;  %v301_v19 = vld [vmem:[#allocation3 + $0x170] sm:$0xff]  ;;  %v304_v20 = vld [vmem:[#allocation3 + $0x188] sm:$0xff]  ;;  %v306_v21 = vld [vmem:[#allocation3 + $0x198] sm:$0xff] }
  0x3c   :  { %680 = vmatpush1.bf16.msra.mxu1 %v679_v38  ;;  %v711_v22 = vpack.c.bf16 %v301_v19, %v299_v18  ;;  %v713_v23 = vpack.c.bf16 %v306_v21, %v304_v20  ;;  %v303_v24 = vld [vmem:[#allocation3 + $0x180] sm:$0xff]  ;;  %v305_v25 = vld [vmem:[#allocation3 + $0x190] sm:$0xff]  ;;  %v308_v26 = vld [vmem:[#allocation3 + $0x1a8] sm:$0xff] }
  0x3d   :  { %682 = vmatprep.subr.bf16.mxu1 %v681_v39  ;;  %v310_v27 = vld [vmem:[#allocation3 + $0x1b8] sm:$0xff]  ;;  %v715_v28 = vpack.c.bf16 %v305_v25, %v303_v24  ;;  %v307_v30 = vld [vmem:[#allocation3 + $0x1a0] sm:$0xff]  ;;  %v309_v31 = vld [vmem:[#allocation3 + $0x1b0] sm:$0xff] }
  0x3e   :  { %v717_v29 = vpack.c.bf16 %v310_v27, %v308_v26  ;;  %v312_v32 = vld [vmem:[#allocation3 + $0x1c8] sm:$0xff]  ;;  %v314_v33 = vld [vmem:[#allocation3 + $0x1d8] sm:$0xff]  ;;  %v719_v34 = vpack.c.bf16 %v309_v31, %v307_v30  ;;  %v311_v36 = vld [vmem:[#allocation3 + $0x1c0] sm:$0xff] }
  0x3f   :  { %v721_v35 = vpack.c.bf16 %v314_v33, %v312_v32  ;;  %v313_v37 = vld [vmem:[#allocation3 + $0x1d0] sm:$0xff]  ;;  %v316_v39 = vld [vmem:[#allocation3 + $0x1e8] sm:$0xff]  ;;  %v318_v40 = vld [vmem:[#allocation3 + $0x1f8] sm:$0xff] }
  0x40   :  { %684 = vmatpush1.bf16.msra.mxu1 %v683_v44  ;;  %v723_v38 = vpack.c.bf16 %v313_v37, %v311_v36  ;;  %v725_v41 = vpack.c.bf16 %v318_v40, %v316_v39  ;;  %v315_v42 = vld [vmem:[#allocation3 + $0x1e0] sm:$0xff]  ;;  %v317_v43 = vld [vmem:[#allocation3 + $0x1f0] sm:$0xff]  ;;  %v407_v46 = vld [vmem:[#allocation5 + $0x18] sm:$0xff] }
  0x41   :  { %686 = vmatprep.subr.bf16.mxu1 %v685_v45  ;;  %v727_v44 = vpack.c.bf16 %v317_v43, %v315_v42  ;;  %v405_v45 = vld [vmem:[#allocation5 + $0x8] sm:$0xff]  ;;  %v404_v47 = vld [vmem:[#allocation5] sm:$0xff]  ;;  %v406_v49 = vld [vmem:[#allocation5 + $0x10] sm:$0xff] }
  0x42   :  { %v729_v48 = vpack.c.bf16 %v407_v46, %v405_v45  ;;  %v731_v52 = vpack.c.bf16 %v406_v49, %v404_v47  ;;  %v408_v54 = vld [vmem:[#allocation5 + $0x20] sm:$0xff]  ;;  %v410_v55 = vld [vmem:[#allocation5 + $0x30] sm:$0xff]  ;;  %v445_v40 = vld [vmem:[#allocation5 + $0x148] sm:$0xff] }
  0x43   :  { %v735_v58 = vpack.c.bf16 %v410_v55, %v408_v54  ;;  %v412_v60 = vld [vmem:[#allocation5 + $0x40] sm:$0xff]  ;;  %v414_v61 = vld [vmem:[#allocation5 + $0x50] sm:$0xff]  ;;  %v449_v46 = vld [vmem:[#allocation5 + $0x168] sm:$0xff] }
  0x44   :  { %688 = vmatpush1.bf16.msra.mxu1 %v687_v50  ;;  %v409_v50 = vld [vmem:[#allocation5 + $0x28] sm:$0xff]  ;;  %730 = vmatprep.subr.bf16.mxu0 %v729_v48  ;;  %v739_v0 = vpack.c.bf16 %v414_v61, %v412_v60  ;;  %v416_v2 = vld [vmem:[#allocation5 + $0x60] sm:$0xff]  ;;  %v418_v3 = vld [vmem:[#allocation5 + $0x70] sm:$0xff] }
  0x45   :  { %690 = vmatprep.subr.bf16.mxu1 %v689_v51  ;;  %v411_v51 = vld [vmem:[#allocation5 + $0x38] sm:$0xff]  ;;  %732 = vmatpush1.bf16.msra.mxu0 %v731_v52  ;;  %v743_v6 = vpack.c.bf16 %v418_v3, %v416_v2  ;;  %v420_v8 = vld [vmem:[#allocation5 + $0x80] sm:$0xff]  ;;  %v422_v9 = vld [vmem:[#allocation5 + $0x90] sm:$0xff] }
  0x46   :  { %v733_v53 = vpack.c.bf16 %v411_v51, %v409_v50  ;;  %v747_v12 = vpack.c.bf16 %v422_v9, %v420_v8  ;;  %v424_v14 = vld [vmem:[#allocation5 + $0xa0] sm:$0xff]  ;;  %v426_v15 = vld [vmem:[#allocation5 + $0xb0] sm:$0xff]  ;;  %v451_v47 = vld [vmem:[#allocation5 + $0x178] sm:$0xff] }
  0x47   :  { %v751_v18 = vpack.c.bf16 %v426_v15, %v424_v14  ;;  %v428_v20 = vld [vmem:[#allocation5 + $0xc0] sm:$0xff]  ;;  %v430_v21 = vld [vmem:[#allocation5 + $0xd0] sm:$0xff]  ;;  %v773_v49 = vpack.c.bf16 %v451_v47, %v449_v46  ;;  %v453_v52 = vld [vmem:[#allocation5 + $0x188] sm:$0xff] }
  0x48   :  { %692 = vmatpush1.bf16.msra.mxu1 %v691_v56  ;;  %v413_v56 = vld [vmem:[#allocation5 + $0x48] sm:$0xff]  ;;  %734 = vmatprep.subr.bf16.mxu0 %v733_v53  ;;  %v755_v24 = vpack.c.bf16 %v430_v21, %v428_v20  ;;  %v432_v26 = vld [vmem:[#allocation5 + $0xe0] sm:$0xff]  ;;  %v434_v27 = vld [vmem:[#allocation5 + $0xf0] sm:$0xff] }
  0x49   :  { %694 = vmatprep.subr.bf16.mxu1 %v693_v57  ;;  %v415_v57 = vld [vmem:[#allocation5 + $0x58] sm:$0xff]  ;;  %736 = vmatpush1.bf16.msra.mxu0 %v735_v58  ;;  %v759_v30 = vpack.c.bf16 %v434_v27, %v432_v26  ;;  %v436_v32 = vld [vmem:[#allocation5 + $0x100] sm:$0xff]  ;;  %v438_v33 = vld [vmem:[#allocation5 + $0x110] sm:$0xff] }
  0x4a   :  { %v737_v59 = vpack.c.bf16 %v415_v57, %v413_v56  ;;  %v763_v36 = vpack.c.bf16 %v438_v33, %v436_v32  ;;  %v442_v39 = vld [vmem:[#allocation5 + $0x130] sm:$0xff]  ;;  %v448_v50 = vld [vmem:[#allocation5 + $0x160] sm:$0xff]  ;;  %v455_v53 = vld [vmem:[#allocation5 + $0x198] sm:$0xff] }
  0x4b   :  { %v446_v45 = vld [vmem:[#allocation5 + $0x150] sm:$0xff]  ;;  %v777_v55 = vpack.c.bf16 %v455_v53, %v453_v52  ;;  %v452_v56 = vld [vmem:[#allocation5 + $0x180] sm:$0xff]  ;;  %v457_v58 = vld [vmem:[#allocation5 + $0x1a8] sm:$0xff] }
  0x4c   :  { %696 = vmatpush1.bf16.msra.mxu1 %v695_v62  ;;  %v417_v62 = vld [vmem:[#allocation5 + $0x68] sm:$0xff]  ;;  %738 = vmatprep.subr.bf16.mxu0 %v737_v59  ;;  %v450_v51 = vld [vmem:[#allocation5 + $0x170] sm:$0xff]  ;;  %v459_v59 = vld [vmem:[#allocation5 + $0x1b8] sm:$0xff] }
  0x4d   :  { %698 = vmatprep.subr.bf16.mxu1 %v697_v63  ;;  %v419_v63 = vld [vmem:[#allocation5 + $0x78] sm:$0xff]  ;;  %740 = vmatpush1.bf16.msra.mxu0 %v739_v0  ;;  %v775_v54 = vpack.c.bf16 %v450_v51, %v448_v50  ;;  %v454_v57 = vld [vmem:[#allocation5 + $0x190] sm:$0xff]  ;;  %v781_v61 = vpack.c.bf16 %v459_v59, %v457_v58  ;;  %v461_v0 = vld [vmem:[#allocation5 + $0x1c8] sm:$0xff] }
  0x4e   :  { %v741_v1 = vpack.c.bf16 %v419_v63, %v417_v62  ;;  %v779_v60 = vpack.c.bf16 %v454_v57, %v452_v56  ;;  %v456_v62 = vld [vmem:[#allocation5 + $0x1a0] sm:$0xff]  ;;  %v458_v63 = vld [vmem:[#allocation5 + $0x1b0] sm:$0xff]  ;;  %v465_v20 = vld [vmem:[#allocation5 + $0x1e8] sm:$0xff] }
  0x4f   :  { %v783_v2 = vpack.c.bf16 %v458_v63, %v456_v62  ;;  %v467_v21 = vld [vmem:[#allocation5 + $0x1f8] sm:$0xff] }
  0x50   :  { %700 = vmatpush1.bf16.msra.mxu1 %v699_v4  ;;  %v421_v4 = vld [vmem:[#allocation5 + $0x88] sm:$0xff]  ;;  %742 = vmatprep.subr.bf16.mxu0 %v741_v1  ;;  %v463_v1 = vld [vmem:[#allocation5 + $0x1d8] sm:$0xff] }
  0x51   :  { %702 = vmatprep.subr.bf16.mxu1 %v701_v5  ;;  %v423_v5 = vld [vmem:[#allocation5 + $0x98] sm:$0xff]  ;;  %744 = vmatpush1.bf16.msra.mxu0 %v743_v6  ;;  %v785_v3 = vpack.c.bf16 %v463_v1, %v461_v0 }
  0x52   :  { %v745_v7 = vpack.c.bf16 %v423_v5, %v421_v4  ;;  %v241_v4 = vlaneseq  ;;  %v319_v26 = vld [vmem:[%s998_s6] sm:$0x3] }
  0x54   :  { %704 = vmatpush1.bf16.msra.mxu1 %v703_v10  ;;  %v425_v10 = vld [vmem:[#allocation5 + $0xa8] sm:$0xff]  ;;  %746 = vmatprep.subr.bf16.mxu0 %v745_v7  ;;  %v242_v5 = vshrl.u32 %v241_v4, 7  ;;  %v239_v7 = vld [vmem:[%s996_s4] sm:$0x3] }
  0x55   :  { %706 = vmatprep.subr.bf16.mxu1 %v705_v11  ;;  %v427_v11 = vld [vmem:[#allocation5 + $0xb8] sm:$0xff]  ;;  %748 = vmatpush1.bf16.msra.mxu0 %v747_v12 }
  0x56   :  { %v749_v13 = vpack.c.bf16 %v427_v11, %v425_v10  ;;  %v243_v6 = vsub.s32 0, %v242_v5  ;;  %v247_v8 = vsub.s32 1, %v242_v5 }
  0x58   :  { %708 = vmatpush1.bf16.msra.mxu1 %v707_v16  ;;  %v429_v16 = vld [vmem:[#allocation5 + $0xc8] sm:$0xff]  ;;  %750 = vmatprep.subr.bf16.mxu0 %v749_v13  ;;  %v244_v9 = vrot.slane %v239_v7, %v243_v6  ;;  %v248_v10 = vrot.slane %v239_v7, %v247_v8  ;;  %v324_v27 = vrot.slane %v319_v26, %v243_v6 }
  0x59   :  { %710 = vmatprep.subr.bf16.mxu1 %v709_v17  ;;  %v431_v17 = vld [vmem:[#allocation5 + $0xd8] sm:$0xff]  ;;  %752 = vmatpush1.bf16.msra.mxu0 %v751_v18  ;;  %v462_v18 = vld [vmem:[#allocation5 + $0x1d0] sm:$0xff] }
  0x5a   :  { %v753_v19 = vpack.c.bf16 %v431_v17, %v429_v16  ;;  %v460_v17 = vld [vmem:[#allocation5 + $0x1c0] sm:$0xff] }
  0x5c   :  { %712 = vmatpush1.bf16.msra.mxu1 %v711_v22  ;;  %v433_v22 = vld [vmem:[#allocation5 + $0xe8] sm:$0xff]  ;;  %754 = vmatprep.subr.bf16.mxu0 %v753_v19  ;;  %v787_v19 = vpack.c.bf16 %v462_v18, %v460_v17 }
  0x5d   :  { %714 = vmatprep.subr.bf16.mxu1 %v713_v23  ;;  %v435_v23 = vld [vmem:[#allocation5 + $0xf8] sm:$0xff]  ;;  %756 = vmatpush1.bf16.msra.mxu0 %v755_v24  ;;  %v466_v24 = vld [vmem:[#allocation5 + $0x1f0] sm:$0xff] }
  0x5e   :  { %v757_v25 = vpack.c.bf16 %v435_v23, %v433_v22  ;;  %v789_v22 = vpack.c.bf16 %v467_v21, %v465_v20  ;;  %v464_v23 = vld [vmem:[#allocation5 + $0x1e0] sm:$0xff] }
  0x60   :  { %716 = vmatpush1.bf16.msra.mxu1 %v715_v28  ;;  %v437_v28 = vld [vmem:[#allocation5 + $0x108] sm:$0xff]  ;;  %758 = vmatprep.subr.bf16.mxu0 %v757_v25  ;;  %v791_v25 = vpack.c.bf16 %v466_v24, %v464_v23 }
  0x61   :  { %718 = vmatprep.subr.bf16.mxu1 %v717_v29  ;;  %v439_v29 = vld [vmem:[#allocation5 + $0x118] sm:$0xff]  ;;  %760 = vmatpush1.bf16.msra.mxu0 %v759_v30 }
  0x62   :  { %v761_v31 = vpack.c.bf16 %v439_v29, %v437_v28  ;;  %v328_v28 = vrot.slane %v319_v26, %v247_v8 }
  0x64   :  { %720 = vmatpush1.bf16.msra.mxu1 %v719_v34  ;;  %v441_v34 = vld [vmem:[#allocation5 + $0x128] sm:$0xff]  ;;  %762 = vmatprep.subr.bf16.mxu0 %v761_v31 }
  0x65   :  { %722 = vmatprep.subr.bf16.mxu1 %v721_v35  ;;  %v443_v35 = vld [vmem:[#allocation5 + $0x138] sm:$0xff]  ;;  %764 = vmatpush1.bf16.msra.mxu0 %v763_v36 }
  0x66   :  { %v765_v37 = vpack.c.bf16 %v443_v35, %v441_v34  ;;  %v553_v35 = vld [vmem:[%s1001_s9] sm:$0x3] }
  0x67   :  { %v572_v36 = vrot.slane %v553_v35, %v247_v8 }
  0x68   :  { %724 = vmatpush1.bf16.msra.mxu1 %v723_v38  ;;  %v440_v38 = vld [vmem:[#allocation5 + $0x120] sm:$0xff]  ;;  %766 = vmatprep.subr.bf16.mxu0 %v765_v37  ;;  %v554_v37 = vld [vmem:[#allocation2] sm:$0x1] }
  0x69   :  { %726 = vmatprep.subr.bf16.mxu1 %v725_v41  ;;  %v447_v41 = vld [vmem:[#allocation5 + $0x158] sm:$0xff]  ;;  %v767_v42 = vpack.c.bf16 %v442_v39, %v440_v38  ;;  %v858_v38 = vmov 0  }
  0x6a   :  { %v769_v43 = vpack.c.bf16 %v447_v41, %v445_v40  ;;  %802 = vset.pattern.permute.xlu0 %v858_v38  ;;  %v468_v39 = vld [vmem:[%s1000_s8] sm:$0x3] }
  0x6b   :  { %768 = vmatpush1.bf16.msra.mxu0 %v767_v42  ;;  %557 = vperm.xlu0 %802, %v554_v37   ;;  %v473_v40 = vrot.slane %v468_v39, %v243_v6  ;;  %v477_v41 = vrot.slane %v468_v39, %v247_v8 }
  0x6c   :  { %728 = vmatpush1.bf16.msra.mxu1 %v727_v44  ;;  %v444_v44 = vld [vmem:[#allocation5 + $0x140] sm:$0xff]  ;;  %770 = vmatprep.subr.bf16.mxu0 %v769_v43 }
  0x6d   :  { %v771_v48 = vpack.c.bf16 %v446_v45, %v444_v44 }
  0x6f   :  { %772 = vmatpush1.bf16.msra.mxu0 %v771_v48  ;;  %v568_v48 = vrot.slane %v553_v35, %v243_v6 }
  0x70   :  { %774 = vmatprep.subr.bf16.mxu0 %v773_v49 }
  0x73   :  { %776 = vmatpush1.bf16.msra.mxu0 %v775_v54 }
  0x74   :  { %778 = vmatprep.subr.bf16.mxu0 %v777_v55 }
  0x77   :  { %780 = vmatpush1.bf16.msra.mxu0 %v779_v60 }
  0x78   :  { %782 = vmatprep.subr.bf16.mxu0 %v781_v61 }
  0x7b   :  { %784 = vmatpush1.bf16.msra.mxu0 %v783_v2 }
  0x7c   :  { %786 = vmatprep.subr.bf16.mxu0 %v785_v3 }
  0x7f   :  { %788 = vmatpush1.bf16.msra.mxu0 %v787_v19 }
  0x80   :  { %790 = vmatprep.subr.bf16.mxu0 %v789_v22 }
  0x83   :  { %792 = vmatpush1.bf16.msra.mxu0 %v791_v25 }
  0xea   :  { %v558_v49 = vpop.permute.xlu0 %557 }
  0xeb   :  { %v563_v50 = vrot.slane %v558_v49, %v243_v6 }
 0x108   :  { %v234_v11 = vpop.f32.mrb[0].mxu0 }
 0x109   :  { %v251_v12 = vadd.f32 %v244_v9, %v234_v11  ;;  %v236_v13 = vpop.f32.mrb[1].mxu0 }
 0x10a   :  { %v252_v14 = vadd.f32 %v248_v10, %v236_v13 }
 0x10b   :  { %v253_v16 = vmax.f32 %v251_v12, 0.0 }
 0x10c   :  { %v254_v15 = vmax.f32 %v252_v14, 0.0 }
 0x10e   :  { %395 = vmatprep.mubr.f32.mxu1 %v254_v15 }
 0x10f   :  { %396 = vmatmul.mubr.f32.vlgmr.msra.gmra.mrb[0].mxu1 %v253_v16 }
 0x110   :  { %639 = vmatprep.mubr.f32.mxu1 %v572_v36 }
 0x1e2   :  { %v397_v29 = vpop.f32.mrb[0].mxu1 }
 0x1e3   :  { %v398_v30 = vadd.f32 %v397_v29, %v324_v27  ;;  %v399_v31 = vpop.f32.mrb[1].mxu1 }
 0x1e4   :  { %v400_v32 = vadd.f32 %v399_v31, %v328_v28 }
 0x1e5   :  { %v402_v34 = vmax.f32 %v398_v30, 0.0 }
 0x1e6   :  { %v403_v33 = vmax.f32 %v400_v32, 0.0 }
 0x1e8   :  { %544 = vmatprep.mubr.f32.mxu0 %v403_v33 }
 0x1e9   :  { %545 = vmatmul.mubr.f32.vlgmr.msra.gmra.mrb[2].mxu0 %v402_v34 }
 0x2bc   :  { %v546_v42 = vpop.f32.mrb[2].mxu0 }
 0x2bd   :  { %v547_v43 = vadd.f32 %v546_v42, %v473_v40  ;;  %v548_v44 = vpop.f32.mrb[3].mxu0 }
 0x2be   :  { %v549_v45 = vadd.f32 %v548_v44, %v477_v41 }
 0x2bf   :  { %v551_v47 = vmax.f32 %v547_v43, 0.0 }
 0x2c0   :  { %v552_v46 = vmax.f32 %v549_v45, 0.0 }
 0x2c2   :  { %575 = vmatprep.subr.mxu1 %v552_v46 }
 0x2c3   :  { %576 = vmatpush1.xpose.msra.mxu1 %v551_v47 }
 0x2c6   :  { %640 = vmatmul.mubr.f32.vlgmr.msra.gmra.mrb[2].mxu1 %v568_v48 }
 0x399   :  { %v641_v51 = vpop.f32.mrb[2].mxu1 }
 0x39a   :  { %v642_v52 = vadd.f32 %v641_v51, %v563_v50  ;;  %v643_v53 = vpop.f32.mrb[3].mxu1 }
 0x39c   :  { %646 = vst.msk [vmem:[%s1003_s11] sm:$0x1] %vm645_vm6, %v642_v52 }
 0x39d   :  { %651 = vsyncpa [#allocation4], 1 }
 0x39e   :  { %652 = vsyncpa [#allocation6], 1 }

</bundles_post_ra>
